<compile_context>
chip_gen: v7x
topology: tpu7x:2x2x1
jax: 0.10.0
libtpu: 0.0.40
codegen_flags: <defaults>
</compile_context>

<pallas_src>
import functools
import math

import jax
import jax.numpy as jnp
from jax.experimental import pallas as pl
from jax.experimental.pallas import tpu as pltpu


def _round_up(x, m):
    return ((x + m - 1) // m) * m


def _pow(base, gamma):
    """base ** gamma, using repeated multiplies for small integral gamma."""
    g = float(gamma)
    if g.is_integer() and 0 <= g <= 8:
        ig = int(g)
        if ig == 0:
            return jnp.ones_like(base)
        r = base
        for _ in range(ig - 1):
            r = r * base
        return r
    return base ** g  # non-integral gamma: falls back to exp/log on the EUP


def _focal_loss_kernel(cls_ref, sel_ref, x_ref, t_ref, out_ref, acc_ref, *,
                       gamma, alpha, highp):
    s = pl.program_id(1)

    @pl.when(s == 0)
    def _():
        acc_ref[...] = jnp.zeros_like(acc_ref)

    x = x_ref[...].astype(jnp.float32)          # (tr, LW) lane-dense logits
    cls = cls_ref[...]                          # (1, LW) class id per lane (f32)
    sel = sel_ref[...]                          # (k, LW) 0/1 group selector

    # Broadcast each reshaped row's k targets across their C-lane groups with
    # one MXU matmul. Exact: targets are small integers, selector is 0/1
    # (HIGHEST precision only requested when C > 256).
    prec = jax.lax.Precision.HIGHEST if highp else None
    t_b = jnp.dot(t_ref[...].astype(jnp.float32), sel,
                  precision=prec, preferred_element_type=jnp.float32)

    # Numerically-stable sigmoid / log-sigmoid: 1 exp + 1 log + 1 div per elem.
    e = jnp.exp(-jnp.abs(x))                    # EUP
    inv = 1.0 / (1.0 + e)
    p_hi = inv                                  # sigmoid(|x|)
    p_lo = e * inv                              # sigmoid(-|x|)
    x_pos = x >= 0.0
    p = jnp.where(x_pos, p_hi, p_lo)            # sigmoid(x)
    q = jnp.where(x_pos, p_lo, p_hi)            # 1 - sigmoid(x), no cancellation
    log1pe = jnp.log(1.0 + e)                   # EUP
    log_p = jnp.minimum(x, 0.0) - log1pe        # log(sigmoid(x))
    log_q = -jnp.maximum(x, 0.0) - log1pe       # log(1 - sigmoid(x))

    term1 = _pow(q, gamma) * log_p
    term2 = _pow(p, gamma) * log_q

    is_match = t_b == cls                       # positive class for this lane
    is_valid = t_b >= 0.0                       # t >= 0 (row padding uses -1)
    loss = -jnp.where(is_match, alpha * term1,
                      jnp.where(is_valid, (1.0 - alpha) * term2, 0.0))

    # Fold this tile's sublane groups into the small (8, LW) accumulator.
    # The reshape splits along existing (8,128) tile boundaries (free); the
    # reduction over the leading axis is plain VPU adds.
    lw = loss.shape[1]
    acc_ref[...] += jnp.sum(loss.reshape(-1, 8, lw), axis=0)

    @pl.when(s == pl.num_programs(1) - 1)
    def _():
        total = jnp.sum(acc_ref[...])           # one small XLU reduction per core
        out_ref[...] = jnp.zeros(out_ref.shape, out_ref.dtype) + total


def sigmoid_focal_loss(out, target, *, gamma=2.0, alpha=0.25,
                       block_rows=2048, num_partitions=2):
    """Scalar focal loss, equivalent to SigmoidFocalLoss(gamma, alpha)(out, target)."""
    N, C = out.shape

    # Lane-dense packing: k original rows per reshaped row, lw = k*C lanes.
    lw = (C * 128) // math.gcd(C, 128)          # lcm(C, 128)
    k = lw // C

    itemsize = jnp.dtype(out.dtype).itemsize
    sub = max(8, 32 // itemsize)                # sublane granularity for dtype

    R = int(pl.cdiv(N, k))                      # reshaped rows needed
    P = max(1, min(int(num_partitions), int(pl.cdiv(R, sub))))

    # VMEM budget: keep the f32 working tile ~1 MiB so the handful of live
    # elementwise temporaries + double-buffered input stay well under the
    # 32 MiB scoped-VMEM limit on every chip generation.
    max_rows_by_vmem = max(sub, ((1 << 20) // (lw * 4)) // sub * sub)
    tr = min(int(block_rows), max_rows_by_vmem,
             _round_up(int(pl.cdiv(R, P)), sub))
    tr = max(sub, _round_up(tr, sub))
    nsteps = int(pl.cdiv(R, P * tr))
    # Re-spread rows evenly over the grid -> minimal tail padding.
    tr = max(sub, _round_up(int(pl.cdiv(R, P * nsteps)), sub))
    r_pad = P * tr * nsteps
    n_pad = r_pad * k

    tgt = target.astype(jnp.int32)
    if n_pad != N:
        out = jnp.pad(out, ((0, n_pad - N), (0, 0)))             # zero logits
        tgt = jnp.pad(tgt, (0, n_pad - N), constant_values=-1)   # -1 -> 0 loss

    x2d = out.reshape(r_pad, lw)        # contiguous merge; no dtype upcast here
    t2d = tgt.reshape(r_pad, k)

    # Tiny constant operands (block index is constant -> stay VMEM-resident).
    lane = jnp.arange(lw, dtype=jnp.int32)
    class_ids = ((lane % C) + 1).astype(jnp.float32).reshape(1, lw)
    sel = (lane[None, :] // C ==
           jnp.arange(k, dtype=jnp.int32)[:, None]).astype(jnp.float32)

    kernel = functools.partial(_focal_loss_kernel, gamma=float(gamma),
                               alpha=float(alpha), highp=(C > 256))

    partials = pl.pallas_call(
        kernel,
        out_shape=jax.ShapeDtypeStruct((P, 8, 128), jnp.float32),
        grid_spec=pltpu.PrefetchScalarGridSpec(
            num_scalar_prefetch=0,
            grid=(P, nsteps),
            in_specs=[
                pl.BlockSpec((1, lw), lambda p, s: (0, 0)),                 # class ids
                pl.BlockSpec((k, lw), lambda p, s: (0, 0)),                 # selector
                pl.BlockSpec((tr, lw), lambda p, s: (p * nsteps + s, 0)),   # logits
                pl.BlockSpec((tr, k), lambda p, s: (p * nsteps + s, 0)),    # targets
            ],
            out_specs=pl.BlockSpec((1, 8, 128), lambda p, s: (p, 0, 0)),
            scratch_shapes=[pltpu.VMEM((8, lw), jnp.float32)],
        ),
        compiler_params=pltpu.CompilerParams(
            dimension_semantics=("parallel", "arbitrary"),
            vmem_limit_bytes=32 << 20,
        ),
    )(class_ids, sel, x2d, t2d)

    return jnp.sum(partials[:, 0, 0])


def _reference_focal_loss(out, target, gamma, alpha):
    """Pure-JAX mirror of the PyTorch forward, for a sanity check."""
    N, C = out.shape
    class_ids = jnp.arange(1, C + 1, dtype=jnp.int32)[None, :]   # (1, C)
    t = target.astype(jnp.int32)[:, None]                        # (N, 1)
    p = jax.nn.sigmoid(out.astype(jnp.float32))
    term1 = (1.0 - p) ** gamma * jnp.log(p)
    term2 = p ** gamma * jnp.log(1.0 - p)
    pos = (t == class_ids).astype(jnp.float32)
    neg = ((t != class_ids) & (t >= 0)).astype(jnp.float32)
    loss = -pos * alpha * term1 - neg * (1.0 - alpha) * term2
    return loss.sum()


if __name__ == "__main__":
    key = jax.random.PRNGKey(0)

    configs = [
        # (N, C, gamma, alpha)
        (800, 10, 2.0, 0.25),   # FCOS3D-style 10 classes; non-power-of-2 C; padded tail
        (512, 16, 3.0, 0.5),    # power-of-2 C; integer gamma != 2; no padding needed
    ]
    for i, (N, C, gamma, alpha) in enumerate(configs):
        k_out, k_tgt, key = jax.random.split(key, 3)
        out = jax.random.normal(k_out, (N, C), dtype=jnp.float32)
        # targets in [0, C]: 0 = background, 1..C = class ids
        target = jax.random.randint(k_tgt, (N,), 0, C + 1, dtype=jnp.int32)

        loss = sigmoid_focal_loss(out, target, gamma=gamma, alpha=alpha)
        loss = jax.block_until_ready(loss)

        ref = _reference_focal_loss(out, target, gamma, alpha)
        assert jnp.allclose(loss, ref, rtol=1e-4, atol=1e-3), (i, loss, ref)

    print("KERNEL_OK")
</pallas_src>

<mosaic_0001>
module attributes {stable_mosaic.version = 11 : i64} {
  func.func @_focal_loss_kernel(%arg0: i32, %arg1: i32, %arg2: memref<1x640xf32, #tpu.memory_space<vmem>>, %arg3: memref<64x640xf32, #tpu.memory_space<vmem>>, %arg4: memref<8x640xf32, #tpu.memory_space<vmem>>, %arg5: memref<8x64xi32, #tpu.memory_space<vmem>>, %arg6: memref<1x8x128xf32, #tpu.memory_space<vmem>>, %arg7: memref<8x640xf32, #tpu.memory_space<vmem>>) attributes {dimension_semantics = [#tpu.dimension_semantics<parallel>, #tpu.dimension_semantics<arbitrary>], iteration_bounds = array<i64: 2, 1>, scalar_prefetch = 0 : i64, scratch_operands = 1 : i64, tpu.core_type = #tpu.core_type<tc>, window_params = [{pipeline_mode = #tpu.pipeline_mode<synchronous>, transform_indices = @transform_0, window_bounds = array<i64: 1, 640>}, {pipeline_mode = #tpu.pipeline_mode<synchronous>, transform_indices = @transform_1, window_bounds = array<i64: 64, 640>}, {transform_indices = @transform_2, window_bounds = array<i64: 8, 640>}, {transform_indices = @transform_3, window_bounds = array<i64: 8, 64>}, {transform_indices = @transform_4, window_bounds = array<i64: 1, 8, 128>}]} {
    %c0_i32 = arith.constant 0 : i32
    %0 = arith.cmpi eq, %arg1, %c0_i32 : i32
    %1 = arith.extui %0 : i1 to i32
    %c0_i32_0 = arith.constant 0 : i32
    %2 = arith.cmpi ne, %1, %c0_i32_0 : i32
    scf.if %2 {
      %cst_28 = arith.constant 0.000000e+00 : f32
      %58 = vector.broadcast %cst_28 : f32 to vector<8x640xf32>
      %c0_29 = arith.constant 0 : index
      %c0_30 = arith.constant 0 : index
      %59 = vector.load %arg7[%c0_29, %c0_30] : memref<8x640xf32, #tpu.memory_space<vmem>>, vector<8x640xf32>
      tpu.vector_store %arg7[%c0_29, %c0_30], %58 {strides = array<i32>} : memref<8x640xf32, #tpu.memory_space<vmem>>, vector<8x640xf32>,
    } else {
    }
    %c0 = arith.constant 0 : index
    %c0_1 = arith.constant 0 : index
    %3 = vector.load %arg4[%c0, %c0_1] : memref<8x640xf32, #tpu.memory_space<vmem>>, vector<8x640xf32>
    %c0_2 = arith.constant 0 : index
    %c0_3 = arith.constant 0 : index
    %4 = vector.load %arg2[%c0_2, %c0_3] : memref<1x640xf32, #tpu.memory_space<vmem>>, vector<1x640xf32>
    %c0_4 = arith.constant 0 : index
    %c0_5 = arith.constant 0 : index
    %5 = vector.load %arg3[%c0_4, %c0_5] : memref<64x640xf32, #tpu.memory_space<vmem>>, vector<64x640xf32>
    %c0_6 = arith.constant 0 : index
    %c0_7 = arith.constant 0 : index
    %6 = vector.load %arg5[%c0_6, %c0_7] : memref<8x64xi32, #tpu.memory_space<vmem>>, vector<8x64xi32>
    %7 = arith.sitofp %6 : vector<8x64xi32> to vector<8x64xf32>
    %cst = arith.constant dense<0.000000e+00> : vector<8x640xf32>
    %8 = tpu.matmul %7, %5, %cst {dimension_numbers = #tpu.dot_dimension_numbers<[1], [0], [0], [1], [0, 0, 1, 1], [], []>} : vector<8x64xf32>, vector<64x640xf32>, vector<8x640xf32> -> vector<8x640xf32>
    %9 = math.absf %3 : vector<8x640xf32>
    %cst_8 = arith.constant 0.000000e+00 : f32
    %10 = vector.broadcast %cst_8 : f32 to vector<8x640xf32>
    %11 = arith.subf %10, %9 : vector<8x640xf32>
    %12 = math.exp %11 : vector<8x640xf32>
    %cst_9 = arith.constant 1.000000e+00 : f32
    %13 = vector.broadcast %cst_9 : f32 to vector<8x640xf32>
    %14 = arith.addf %13, %12 : vector<8x640xf32>
    %cst_10 = arith.constant 1.000000e+00 : f32
    %15 = vector.broadcast %cst_10 : f32 to vector<8x640xf32>
    %16 = arith.divf %15, %14 : vector<8x640xf32>
    %17 = arith.mulf %12, %16 : vector<8x640xf32>
    %cst_11 = arith.constant 0.000000e+00 : f32
    %18 = vector.broadcast %cst_11 : f32 to vector<8x640xf32>
    %19 = arith.cmpf oge, %3, %18 : vector<8x640xf32>
    %20 = arith.select %19, %16, %17 : vector<8x640xi1>, vector<8x640xf32>
    %21 = arith.select %19, %17, %16 : vector<8x640xi1>, vector<8x640xf32>
    %cst_12 = arith.constant 1.000000e+00 : f32
    %22 = vector.broadcast %cst_12 : f32 to vector<8x640xf32>
    %23 = arith.addf %22, %12 : vector<8x640xf32>
    %24 = math.log %23 : vector<8x640xf32>
    %cst_13 = arith.constant 0.000000e+00 : f32
    %25 = vector.broadcast %cst_13 : f32 to vector<8x640xf32>
    %26 = arith.minimumf %3, %25 : vector<8x640xf32>
    %27 = arith.subf %26, %24 : vector<8x640xf32>
    %cst_14 = arith.constant 0.000000e+00 : f32
    %28 = vector.broadcast %cst_14 : f32 to vector<8x640xf32>
    %29 = arith.maximumf %3, %28 : vector<8x640xf32>
    %cst_15 = arith.constant 0.000000e+00 : f32
    %30 = vector.broadcast %cst_15 : f32 to vector<8x640xf32>
    %31 = arith.subf %30, %29 : vector<8x640xf32>
    %32 = arith.subf %31, %24 : vector<8x640xf32>
    %33 = arith.mulf %21, %21 : vector<8x640xf32>
    %34 = arith.mulf %33, %27 : vector<8x640xf32>
    %35 = arith.mulf %20, %20 : vector<8x640xf32>
    %36 = arith.mulf %35, %32 : vector<8x640xf32>
    %37 = vector.broadcast %4 : vector<1x640xf32> to vector<8x640xf32>
    %38 = arith.cmpf oeq, %8, %37 : vector<8x640xf32>
    %cst_16 = arith.constant 0.000000e+00 : f32
    %39 = vector.broadcast %cst_16 : f32 to vector<8x640xf32>
    %40 = arith.cmpf oge, %8, %39 : vector<8x640xf32>
    %cst_17 = arith.constant 2.500000e-01 : f32
    %41 = vector.broadcast %cst_17 : f32 to vector<8x640xf32>
    %42 = arith.mulf %41, %34 : vector<8x640xf32>
    %cst_18 = arith.constant 7.500000e-01 : f32
    %43 = vector.broadcast %cst_18 : f32 to vector<8x640xf32>
    %44 = arith.mulf %43, %36 : vector<8x640xf32>
    %cst_19 = arith.constant 0.000000e+00 : f32
    %45 = vector.broadcast %cst_19 : f32 to vector<8x640xf32>
    %46 = arith.select %40, %44, %45 : vector<8x640xi1>, vector<8x640xf32>
    %47 = arith.select %38, %42, %46 : vector<8x640xi1>, vector<8x640xf32>
    %cst_20 = arith.constant 0.000000e+00 : f32
    %48 = vector.broadcast %cst_20 : f32 to vector<8x640xf32>
    %49 = arith.subf %48, %47 : vector<8x640xf32>
    %c0_21 = arith.constant 0 : index
    %c0_22 = arith.constant 0 : index
    %50 = vector.load %arg7[%c0_21, %c0_22] : memref<8x640xf32, #tpu.memory_space<vmem>>, vector<8x640xf32>
    %51 = vector.shape_cast %49 : vector<8x640xf32> to vector<1x8x640xf32>
    %cst_23 = arith.constant dense<0.000000e+00> : vector<8x640xf32>
    %52 = vector.multi_reduction <add>, %51, %cst_23 [0] : vector<1x8x640xf32> to vector<8x640xf32>
    %53 = arith.addf %50, %52 : vector<8x640xf32>
    %c0_24 = arith.constant 0 : index
    %c0_25 = arith.constant 0 : index
    %54 = vector.load %arg7[%c0_24, %c0_25] : memref<8x640xf32, #tpu.memory_space<vmem>>, vector<8x640xf32>
    tpu.vector_store %arg7[%c0_24, %c0_25], %53 {strides = array<i32>} : memref<8x640xf32, #tpu.memory_space<vmem>>, vector<8x640xf32>,
    %c0_i32_26 = arith.constant 0 : i32
    %55 = arith.cmpi eq, %arg1, %c0_i32_26 : i32
    %56 = arith.extui %55 : i1 to i32
    %c0_i32_27 = arith.constant 0 : i32
    %57 = arith.cmpi ne, %56, %c0_i32_27 : i32
    scf.if %57 {
      %c0_28 = arith.constant 0 : index
      %c0_29 = arith.constant 0 : index
      %58 = vector.load %arg7[%c0_28, %c0_29] : memref<8x640xf32, #tpu.memory_space<vmem>>, vector<8x640xf32>
      %59 = vector.shape_cast %58 : vector<8x640xf32> to vector<1x8x640xf32>
      %cst_30 = arith.constant dense<0.000000e+00> : vector<1xf32>
      %60 = vector.multi_reduction <add>, %59, %cst_30 [1, 2] : vector<1x8x640xf32> to vector<1xf32>
      %61 = vector.shape_cast %60 : vector<1xf32> to vector<1x1x1xf32>
      %62 = vector.extract %61[0, 0, 0] : f32 from vector<1x1x1xf32>
      %cst_31 = arith.constant 0.000000e+00 : f32
      %63 = vector.broadcast %cst_31 : f32 to vector<1x8x128xf32>
      %64 = vector.broadcast %62 : f32 to vector<1x8x128xf32>
      %65 = arith.addf %63, %64 : vector<1x8x128xf32>
      %c0_32 = arith.constant 0 : index
      %c0_33 = arith.constant 0 : index
      %c0_34 = arith.constant 0 : index
      %66 = vector.load %arg6[%c0_32, %c0_33, %c0_34] : memref<1x8x128xf32, #tpu.memory_space<vmem>>, vector<1x8x128xf32>
      tpu.vector_store %arg6[%c0_32, %c0_33, %c0_34], %65 {strides = array<i32>} : memref<1x8x128xf32, #tpu.memory_space<vmem>>, vector<1x8x128xf32>,
    } else {
    }
    return
  }
  func.func @transform_0(%arg0: i32, %arg1: i32) -> (i32, i32) {
    %c0_i32 = arith.constant 0 : i32
    %c0_i32_0 = arith.constant 0 : i32
    %c0_i32_1 = arith.constant 0 : i32
    return %c0_i32, %c0_i32_0 : i32, i32
  }
  func.func @transform_1(%arg0: i32, %arg1: i32) -> (i32, i32) {
    %c0_i32 = arith.constant 0 : i32
    %c0_i32_0 = arith.constant 0 : i32
    %c0_i32_1 = arith.constant 0 : i32
    return %c0_i32, %c0_i32_0 : i32, i32
  }
  func.func @transform_2(%arg0: i32, %arg1: i32) -> (i32, i32) {
    %c1_i32 = arith.constant 1 : i32
    %0 = arith.muli %arg0, %c1_i32 : i32
    %1 = arith.addi %0, %arg1 : i32
    %c0_i32 = arith.constant 0 : i32
    %c0_i32_0 = arith.constant 0 : i32
    return %1, %c0_i32 : i32, i32
  }
  func.func @transform_3(%arg0: i32, %arg1: i32) -> (i32, i32) {
    %c1_i32 = arith.constant 1 : i32
    %0 = arith.muli %arg0, %c1_i32 : i32
    %1 = arith.addi %0, %arg1 : i32
    %c0_i32 = arith.constant 0 : i32
    %c0_i32_0 = arith.constant 0 : i32
    return %1, %c0_i32 : i32, i32
  }
  func.func @transform_4(%arg0: i32, %arg1: i32) -> (i32, i32, i32) {
    %c0_i32 = arith.constant 0 : i32
    %c0_i32_0 = arith.constant 0 : i32
    %c0_i32_1 = arith.constant 0 : i32
    return %arg0, %c0_i32, %c0_i32_0 : i32, i32, i32
  }
}

</mosaic_0001>

<bundles_post_ra>
// kernel: tpu_custom_call.1
= control target key start
LH: loop header
LB: loop body
LE: loop exit
PB: predicated region body
PF: predicated region fallthrough
CT: control target
= control target key end

     0   :  { %s1727_s0 = inlined_call_operand.hbm [shape: f32[1,640], index: 0, kind: input, shape index: {}]   ;;  %s1728_s1 = inlined_call_operand.hbm [shape: f32[64,640], index: 1, kind: input, shape index: {}]   ;;  %s1729_s2 = inlined_call_operand.hbm [shape: f32[16,640], index: 2, kind: input, shape index: {}]   ;;  %s1730_s3 = inlined_call_operand.hbm [shape: s32[16,64], index: 3, kind: input, shape index: {}]   ;;  %s1731_s4 = inlined_call_operand.hbm [shape: f32[2,8,128], index: 4, kind: output, shape index: {}]  }
   0x1   :  { %1742 = sst [smem:[#allocation16_spill]] %s1727_s0 }
   0x2   :  { %1743 = sst [smem:[#allocation17_spill]] %s1729_s2 }
   0x3   :  { %9 = vsyncpa [#allocation4], 0 }
   0x4   :  { %10 = vsyncpa [#allocation7], 0 }
   0x5   :  { %11 = vsyncpa [#allocation5], 0 }
   0x6   :  { %13 = vsyncpa [#allocation5 + $0x1], 0  ;;  %s1378_s15 = smov 0   ;;  %s1380_s16 = smov 0  }
   0x7   :  { %s1382_s17 = smov 0   ;;  %s1384_s18 = smov 0  }
   0x8   :  { %s1386_s19 = smov 0   ;;  %s1388_s20 = smov 0  }
   0x9 LB: > { %s1409_s21 = sadd.s32 4294967295, %s1341_s20   ;;  %s915_s22 = sadd.s32 4294967294, %s1341_s20   ;;  %s1341_s20 = sphi %s1388_s20, %s19_s20   ;;  %s1337_s19 = sphi %s1386_s19, %s1776_s19   ;;  %s1333_s18 = sphi %s1384_s18, %s1775_s18   ;;  %s1329_s17 = sphi %s1382_s17, %s1774_s17   ;;  %s1325_s16 = sphi %s1380_s16, %s1773_s16   ;;  %s1321_s15 = sphi %s1378_s15, %s1772_s15  }
   0xa   : > { %p95_p0 = scmp.ne.s32.totalorder %s1325_s16, %s1321_s15  ;;  %p1732_p1 = scmp.eq.s32.totalorder %s1409_s21, 0 }
   0xb   : > { %p153_p3 = scmp.eq.s32.totalorder %s915_s22, 1  ;;  %p916_p5 = scmp.ge.s32.totalorder %s1341_s20, 1 }
   0xc   : > { %p1418_p4 = por %p1732_p1, %p95_p0  ;;  %p160_p7 = scmp.lt.s32.totalorder %s1341_s20, 3 }
   0xd   : > { %p1423_p6 = por %p153_p3, %p95_p0  ;;  %s1343_s26 = smov [#allocation3]  }
   0xe   : > { %s1744_s23 = scalar_select %p1418_p4, 1, 0 }
   0xf   : > { %s1745_s24 = scalar_select %p1423_p6, 1, 0 }
  0x10   : > { %p1428_p8 = pnand %p916_p5, %p160_p7  ;;  %s173_s27 = sshll.u32 %s1343_s26, 4  ;;  %s174_s27 = int_to_ptr.vmem [resolvable:$true] %s173_s27 }
  0x11   : > { %s31_s29 = sadd.s32 1, %s1337_s19  ;;  %s82_s30 = sadd.s32 1, %s1329_s17 }
  0x12   : > { %s1746_s25 = scalar_select %p1428_p8, 1, 0 }
  0x13   : > { %p1026_p10 = pneg %p1428_p8  ;;  %p1443_p12 = scmp.ge.s32.totalorder %s31_s29, 2 }
  0x14   : > { %s1749_s0 = sld [smem:[#allocation16_spill]] }
  0x15   : > { %p1437_p11 = pnand %p1026_p10, %p1732_p1 }
  0x16   : > { %s1748_s5 = scalar_select %p1443_p12, 1, 0 }
  0x17   : > { %p1736_p0 = pneg %p1437_p11 }
  0x1a   : > { %s1135_s8 = scalar_lea.hbm %s1749_s0, 80 }
  0x1b   : > { %p1136_p13 = scmp.ne.s32.totalorder %s1749_s0, %s1135_s8  ;;  %p1142_p7 = scmp.lt.u32.totalorder %s1135_s8, %s1749_s0 }
  0x1d   : > { %p1138_p3 = pnand %p1736_p0, %p1136_p13 }
  0x1f   : > { %p1139_p5 = pneg %p1138_p3 }
  0x21   : > { %p1144_p10 = pnand %p1142_p7, %p1139_p5 }
  0x23   : > { %1147 = shalt.err (!%p1144_p10)
}
  0x24   : > { %s1148_s13 = scalar_lea.vmem %s174_s27, 80  ;;  %s1155_s14 = scalar_lea.vmem %s174_s27, 96 }
  0x25   : > { %p1149_p9 = scmp.ne.s32.totalorder %s174_s27, %s1148_s13  ;;  %p1156_p6 = scmp.lt.s32.totalorder %s174_s27, %s174_s27 }
  0x26   : > { %p1157_p4 = scmp.lt.s32.totalorder %s1155_s14, %s1148_s13 }
  0x27   : > { %p1151_p1 = pnand %p1149_p9, %p1736_p0 }
  0x28   : > { %p1158_p8 = por %p1157_p4, %p1156_p6 }
  0x29   : > { %p1152_p2 = pneg %p1151_p1 }
  0x2b   : > { %p1159_p12 = pnand %p1158_p8, %p1152_p2 }
  0x2d   : > { %1162 = shalt.err (!%p1159_p12)
}
  0x2e   : > { %1029 = dma.hbm_to_vmem [thread:$0]  (!%p1437_p11), %s1749_s0, 80, %s174_s27, [#allocation4]  }
  0x2f   : > { %p1750_p1 = scmp.ne.s32.totalorder %s1748_s5, 0  ;;  %p89_p2 = scmp.ne.s32.totalorder %s1329_s17, %s1325_s16 }
  0x30   : > { %p90_p4 = scmp.eq.s32.totalorder %s1341_s20, 0  ;;  %p1046_p6 = scmp.lt.s32.totalorder %s1341_s20, 2 }
  0x31   : > { %s1778_s29 = smov (%p1750_p1, %s31_s29), 0  ;;  %p1752_p12 = scmp.eq.s32.totalorder %s1409_s21, 1 }
  0x32   : > { %1751 = sst [smem:[#allocation15_spill]] %s1778_s29  ;;  %s79_s6 = ssub.s32 %s1337_s19, %s1778_s29 }
  0x33   : > { %p80_p8 = scmp.eq.s32.totalorder %s79_s6, 0  ;;  %p91_p9 = por %p90_p4, %p89_p2 }
  0x34   : > { %p1481_p13 = por %p1752_p12, %p89_p2  ;;  %s197_s8 = sand.u32 1, %s1341_s20  }
  0x35   : > { %s1489_s9 = scalar_select %p80_p8, %s1329_s17, %s82_s30  }
  0x36   : > { %s1753_s7 = scalar_select %p1481_p13, 1, 0 }
  0x37   : > { %s1735_s27 = sand.u32 1, %s1329_s17   ;;  %p1494_p3 = pnand %p1046_p6, %p91_p9 }
  0x38   : > { %s1007_s5 = smul.u32 40, %s1735_s27  ;;  %s1755_s2 = sld [smem:[#allocation17_spill]] }
  0x39   : > { %s1754_s10 = scalar_select %p1494_p3, 1, 0 }
  0x3a   : > { %s1008_s11 = smul.u32 640, %s1337_s19  ;;  %s201_s30 = scalar_lea.vmem [#allocation8], %s1007_s5 }
  0x3b   : > { %s210_s22 = sshll.u32 %s201_s30, 4  ;;  %s1344_s26 = smov [#allocation6]   ;;  %s1504_s22 = int_to_ptr.vmem [resolvable:$true] %s210_s22 }
  0x3c   : > { %s1506_s6 = sshll.u32 %s1344_s26, 4  ;;  %s1508_s27 = scalar_lea.sflag [#allocation4], %s197_s8  ;;  %s184_s6 = int_to_ptr.vmem [resolvable:$true] %s1506_s6 }
  0x3d   : > { %p1738_p7 = pneg %p1494_p3 }
  0x3e   : > { %s1502_s14 = scalar_lea.hbm %s1755_s2, %s1008_s11  ;;  %s1168_s5 = scalar_lea.hbm %s1755_s2, 1280 }
  0x3f   : > { %s1163_s0 = scalar_lea.hbm %s1502_s14, 640  ;;  %p1169_p2 = scmp.lt.u32.totalorder %s1502_s14, %s1755_s2 }
  0x40   : > { %p1164_p5 = scmp.ne.s32.totalorder %s1502_s14, %s1163_s0  ;;  %p1170_p4 = scmp.lt.u32.totalorder %s1168_s5, %s1163_s0 }
  0x41   : > { %p1172_p8 = scmp.lt.u32.totalorder %s1163_s0, %s1502_s14 }
  0x42   : > { %p1166_p10 = pnand %p1738_p7, %p1164_p5  ;;  %p1171_p6 = por %p1170_p4, %p1169_p2 }
  0x44   : > { %p1167_p1 = pneg %p1166_p10  ;;  %p1173_p9 = por %p1172_p8, %p1171_p6 }
  0x46   : > { %p1174_p12 = pnand %p1173_p9, %p1167_p1 }
  0x48   : > { %1177 = shalt.err (!%p1174_p12)
}
  0x49   : > { %s1178_s8 = scalar_lea.vmem %s1504_s22, 640  ;;  %s1345_s26 = smov [#allocation8]  }
  0x4a   : > { %p1179_p5 = scmp.ne.s32.totalorder %s1504_s22, %s1178_s8  ;;  %s1183_s11 = sshll.u32 %s1345_s26, 4  ;;  %s1184_s11 = int_to_ptr.vmem [resolvable:$false] %s1183_s11 }
  0x4b   : > { %s1185_s12 = scalar_lea.vmem %s1184_s11, 1280  ;;  %p1186_p13 = scmp.lt.s32.totalorder %s1504_s22, %s1184_s11 }
  0x4c   : > { %p1181_p10 = pnand %p1179_p5, %p1738_p7  ;;  %p1187_p2 = scmp.lt.s32.totalorder %s1185_s12, %s1178_s8 }
  0x4e   : > { %p1182_p0 = pneg %p1181_p10  ;;  %p1188_p4 = por %p1187_p2, %p1186_p13 }
  0x50   : > { %p1189_p6 = pnand %p1188_p4, %p1182_p0 }
  0x52   : > { %1192 = shalt.err (!%p1189_p6)
}
  0x53   : > { %1036 = dma.hbm_to_vmem [thread:$0]  (!%p1494_p3), %s1502_s14, 640, %s1504_s22, %s1508_s27  }
  0x54   : > { %s1756_s0 = sand.u32 1, %s1329_s17   ;;  %s1193_s26 = scalar_lea.hbm %s1728_s1, 5120 }
  0x55   : > { %s921_s5 = sshll.u32 %s1756_s0, 3  ;;  %p1194_p0 = scmp.ne.s32.totalorder %s1728_s1, %s1193_s26 }
  0x56   : > { %p1757_p13 = pneg %p1437_p11  ;;  %p1200_p9 = scmp.lt.u32.totalorder %s1193_s26, %s1728_s1 }
  0x58   : > { %p1196_p1 = pnand %p1194_p0, %p1757_p13 }
  0x5a   : > { %p1197_p8 = pneg %p1196_p1 }
  0x5c   : > { %p1202_p12 = pnand %p1200_p9, %p1197_p8 }
  0x5e   : > { %1205 = shalt.err (!%p1202_p12)
}
  0x5f   : > { %s1206_s14 = scalar_lea.vmem %s184_s6, 5120  ;;  %p1758_p10 = pmov %p1757_p13 }
  0x60   : > { %p1207_p5 = scmp.ne.s32.totalorder %s184_s6, %s1206_s14  ;;  %p1214_p6 = scmp.lt.s32.totalorder %s184_s6, %s184_s6 }
  0x61   : > { %p1215_p7 = scmp.lt.s32.totalorder %s1206_s14, %s1206_s14 }
  0x62   : > { %p1209_p2 = pnand %p1207_p5, %p1758_p10 }
  0x63   : > { %p1216_p3 = por %p1215_p7, %p1214_p6 }
  0x64   : > { %p1210_p4 = pneg %p1209_p2 }
  0x66   : > { %p1217_p0 = pnand %p1216_p3, %p1210_p4 }
  0x68   : > { %1220 = shalt.err (!%p1217_p0)
}
  0x69   : > { %s1346_s22 = smov 640   ;;  %s1347_s2 = smov 40  }
  0x6a   : > { %1032 = dma.hbm_to_vmem [thread:$0]  (!%p1437_p11), %s1728_s1, 5120, %s184_s6, [#allocation7], %s1346_s22, %s1346_s22, %s1347_s2  }
  0x6b   : > { %s922_s30 = sshll.u32 %s1337_s19, 7  ;;  %s221_s12 = scalar_lea.vmem [#allocation9], %s921_s5 }
  0x6c   : > { %s1563_s11 = scalar_lea.hbm %s1730_s3, %s922_s30  ;;  %s229_s14 = sshll.u32 %s221_s12, 4  ;;  %s230_s14 = int_to_ptr.vmem [resolvable:$true] %s229_s14 }
  0x6d   : > { %s1221_s29 = scalar_lea.hbm %s1563_s11, 128  ;;  %p1759_p7 = scmp.ne.s32.totalorder %s1754_s10, 0 }
  0x6e   : > { %p1222_p3 = scmp.ne.s32.totalorder %s1563_s11, %s1221_s29  ;;  %s1226_s22 = scalar_lea.hbm %s1730_s3, 256 }
  0x6f   : > { %p1760_p13 = pneg %p1759_p7  ;;  %p1227_p11 = scmp.lt.u32.totalorder %s1563_s11, %s1730_s3 }
  0x70   : > { %p1228_p9 = scmp.lt.u32.totalorder %s1226_s22, %s1221_s29  ;;  %p1230_p5 = scmp.lt.u32.totalorder %s1221_s29, %s1563_s11 }
  0x71   : > { %p1224_p1 = pnand %p1222_p3, %p1760_p13 }
  0x72   : > { %p1229_p12 = por %p1228_p9, %p1227_p11 }
  0x73   : > { %p1225_p8 = pneg %p1224_p1 }
  0x74   : > { %p1231_p10 = por %p1230_p5, %p1229_p12 }
  0x76   : > { %p1232_p2 = pnand %p1231_p10, %p1225_p8 }
  0x78   : > { %1235 = shalt.err (!%p1232_p2)
}
  0x79   : > { %s1236_s5 = scalar_lea.vmem %s230_s14, 128  ;;  %p1761_p6 = pmov %p1760_p13 }
  0x7a   : > { %p1237_p4 = scmp.ne.s32.totalorder %s230_s14, %s1236_s5  ;;  %s1348_s13 = smov [#allocation9]  }
  0x7b   : > { %s1241_s30 = sshll.u32 %s1348_s13, 4  ;;  %s1242_s30 = int_to_ptr.vmem [resolvable:$false] %s1241_s30 }
  0x7c   : > { %p1239_p0 = pnand %p1237_p4, %p1761_p6  ;;  %s1243_s26 = scalar_lea.vmem %s1242_s30, 256 }
  0x7d   : > { %p1244_p13 = scmp.lt.s32.totalorder %s230_s14, %s1242_s30  ;;  %p1245_p1 = scmp.lt.s32.totalorder %s1243_s26, %s1236_s5 }
  0x7e   : > { %p1240_p3 = pneg %p1239_p0 }
  0x7f   : > { %p1246_p9 = por %p1245_p1, %p1244_p13 }
  0x81   : > { %p1247_p11 = pnand %p1246_p9, %p1240_p3 }
  0x83   : > { %1250 = shalt.err (!%p1247_p11)
}
  0x84   : > { %1039 = dma.hbm_to_vmem [thread:$0]  (!%p1759_p7), %s1563_s11, 128, %s230_s14, %s1508_s27  }
  0x85   : > { %p1762_p8 = scmp.ne.s32.totalorder %s1746_s25, 0 }
  0x86   : > { %p1763_p12 = scmp.eq.s32.totalorder (!%p1762_p8), %s1409_s21, 0 }
  0x87   : > { %238 = sbr.rel (%p1762_p8) target bundleno = 625 (0x271), region = 36 }
  0x8e   : > { %1304 = dma.done.wait (%p1763_p12), [#allocation4], 80   ;;  %p1764_p5 = pmov %p1763_p12 }
  0x90   : > { %1306 = vsyncadd (%p1764_p5), [#allocation4], 4294967216  ;;  %p1765_p10 = pmov %p1764_p5 }
  0x91   : > { %p1766_p2 = pmov %p1764_p5 }
  0x92   : > { %1308 = dma.done.wait (%p1765_p10), [#allocation7], 5120  }
  0x93   : > { %1310 = vsyncadd (%p1766_p2), [#allocation7], 4294962176  ;;  %s248_s29 = sand.u32 1, %s1409_s21   ;;  %s1597_s27 = sand.u32 1, %s1325_s16  }
  0x94   : > { %s1009_s25 = smul.u32 40, %s1597_s27  ;;  %s249_s10 = scalar_lea.sflag [#allocation4], %s248_s29 }
  0x95   : > { %p1767_p7 = scmp.ne.s32.totalorder %s1744_s23, 0 }
  0x96   : > { %s1600_s8 = scalar_lea.vmem [#allocation8], %s1009_s25 }
  0x97   : > { %1312 = dma.done.wait (%p1767_p7), %s249_s10, 768  }
  0x98   : > { %1314 = vsyncadd (%p1767_p7), %s249_s10, 4294966528  ;;  %v1349_v0 = vmov 0.0   ;;  %v309_v1 = vld [vmem:[#allocation6 + $0x8] sm:$0xff]  ;;  %v314_v2 = vld [vmem:[#allocation6 + $0x30] sm:$0xff]  ;;  %s926_s21 = sshll.u32 %s1597_s27, 3  ;;  %vm350_vm0 = vcmask 523264  }
  0x99   : > { %418 = vmatprep.mubr.f32.mxu0 %v1349_v0  ;;  %489 = vmatprep.mubr.f32.mxu1 %v1349_v0  ;;  %v308_v3 = vld [vmem:[#allocation6] sm:$0xff]  ;;  %v963_v4 = vpack.c.bf16 %v314_v2, %v309_v1  ;;  %v313_v5 = vld [vmem:[#allocation6 + $0x28] sm:$0xff]  ;;  %v311_v6 = vld [vmem:[#allocation6 + $0x18] sm:$0xff]  ;;  %s261_s23 = scalar_lea.vmem [#allocation9], %s926_s21  ;;  %v1350_v54 = vmov 0.0|0.0   ;;  %vm1351_vm1 = vmmov 0  }
  0x9a   : > { %v316_v7 = vld [vmem:[#allocation6 + $0x40] sm:$0xff]  ;;  %v965_v8 = vpack.c.bf16 %v313_v5, %v308_v3  ;;  %v319_v10 = vld [vmem:[#allocation6 + $0x58] sm:$0xff]  ;;  %v310_v12 = vld [vmem:[#allocation6 + $0x10] sm:$0xff]  ;;  %s290_s11 = scalar_lea.vmem [#allocation10], %s926_s21  ;;  %s932_s14 = sshll.u32 %s1333_s18, 7 }
  0x9b   : > { %v979_v9 = vpack.c.bf16 %v316_v7, %v311_v6  ;;  %v324_v11 = vld [vmem:[#allocation6 + $0x80] sm:$0xff]  ;;  %964 = vmatprep.subr.bf16.mxu0 %v963_v4  ;;  %v315_v14 = vld [vmem:[#allocation6 + $0x38] sm:$0xff]  ;;  %v318_v15 = vld [vmem:[#allocation6 + $0x50] sm:$0xff]  ;;  %s795_s12 = sshll.u32 %s290_s11, 4  ;;  %s1680_s2 = scalar_lea.hbm %s1731_s4, %s932_s14  ;;  %s1675_s12 = int_to_ptr.vmem [resolvable:$true] %s795_s12 }
  0x9c   : > { %v967_v13 = vpack.c.bf16 %v324_v11, %v319_v10  ;;  %v323_v16 = vld [vmem:[#allocation6 + $0x78] sm:$0xff]  ;;  %966 = vmatpush1.bf16.msra.mxu0 %v965_v8  ;;  %v981_v17 = vpack.c.bf16 %v315_v14, %v310_v12  ;;  %v321_v19 = vld [vmem:[#allocation6 + $0x68] sm:$0xff]  ;;  %v326_v20 = vld [vmem:[#allocation6 + $0x90] sm:$0xff]  ;;  %s782_s0 = scalar_lea.sflag [#allocation5], %s1597_s27  ;;  %s1251_s5 = scalar_lea.vmem %s1675_s12, 128 }
  0x9d   : > { %980 = vmatprep.subr.bf16.mxu1 %v979_v9  ;;  %v969_v18 = vpack.c.bf16 %v323_v16, %v318_v15  ;;  %v329_v21 = vld [vmem:[#allocation6 + $0xa8] sm:$0xff]  ;;  %v983_v22 = vpack.c.bf16 %v326_v20, %v321_v19  ;;  %v334_v23 = vld [vmem:[#allocation6 + $0xd0] sm:$0xff]  ;;  %v320_v24 = vld [vmem:[#allocation6 + $0x60] sm:$0xff]  ;;  %p1252_p4 = scmp.ne.s32.totalorder %s1675_s12, %s1251_s5  ;;  %p1768_p6 = scmp.ne.s32.totalorder %s1753_s7, 0 }
  0x9e   : > { %968 = vmatprep.subr.bf16.mxu0 %v967_v13  ;;  %v325_v25 = vld [vmem:[#allocation6 + $0x88] sm:$0xff]  ;;  %982 = vmatpush1.bf16.msra.mxu1 %v981_v17  ;;  %v971_v26 = vpack.c.bf16 %v334_v23, %v329_v21  ;;  %v328_v28 = vld [vmem:[#allocation6 + $0xa0] sm:$0xff]  ;;  %v331_v30 = vld [vmem:[#allocation6 + $0xb8] sm:$0xff]  ;;  %s1352_s18 = smov [#allocation10]  }
  0x9f   : > { %v985_v27 = vpack.c.bf16 %v325_v25, %v320_v24  ;;  %v333_v29 = vld [vmem:[#allocation6 + $0xc8] sm:$0xff]  ;;  %984 = vmatprep.subr.bf16.mxu1 %v983_v22  ;;  %v336_v31 = vld [vmem:[#allocation6 + $0xe0] sm:$0xff]  ;;  %v339_v32 = vld [vmem:[#allocation6 + $0xf8] sm:$0xff]  ;;  %p1253_p0 = pnand %p1252_p4, %p1768_p6  ;;  %s1255_s13 = sshll.u32 %s1352_s18, 4  ;;  %s1256_s13 = int_to_ptr.vmem [resolvable:$false] %s1255_s13 }
  0xa0   : > { %v344_v33 = vld [vmem:[#allocation6 + $0x120] sm:$0xff]  ;;  %970 = vmatpush1.bf16.msra.mxu0 %v969_v18  ;;  %v973_v34 = vpack.c.bf16 %v333_v29, %v328_v28  ;;  %v987_v35 = vpack.c.bf16 %v336_v31, %v331_v30  ;;  %v330_v36 = vld [vmem:[#allocation6 + $0xb0] sm:$0xff]  ;;  %v335_v37 = vld [vmem:[#allocation6 + $0xd8] sm:$0xff]  ;;  %s1257_s30 = scalar_lea.vmem %s1256_s13, 256  ;;  %p1258_p13 = scmp.lt.s32.totalorder %s1675_s12, %s1256_s13 }
  0xa1   : > { %v338_v38 = vld [vmem:[#allocation6 + $0xf0] sm:$0xff]  ;;  %972 = vmatprep.subr.bf16.mxu0 %v971_v26  ;;  %v975_v39 = vpack.c.bf16 %v344_v33, %v339_v32  ;;  %v343_v40 = vld [vmem:[#allocation6 + $0x118] sm:$0xff]  ;;  %v341_v41 = vld [vmem:[#allocation6 + $0x108] sm:$0xff]  ;;  %v989_v43 = vpack.c.bf16 %v335_v37, %v330_v36  ;;  %p1254_p3 = pneg %p1253_p0  ;;  %p1259_p1 = scmp.lt.s32.totalorder %s1257_s30, %s1251_s5 }
  0xa2   : > { %v346_v42 = vld [vmem:[#allocation6 + $0x130] sm:$0xff]  ;;  %986 = vmatpush1.bf16.msra.mxu1 %v985_v27  ;;  %v340_v45 = vld [vmem:[#allocation6 + $0x100] sm:$0xff]  ;;  %v345_v46 = vld [vmem:[#allocation6 + $0x128] sm:$0xff]  ;;  %v977_v47 = vpack.c.bf16 %v343_v40, %v338_v38  ;;  %v677_v38 = vlaneseq }
  0xa3   : > { %988 = vmatprep.subr.bf16.mxu1 %v987_v35  ;;  %v991_v44 = vpack.c.bf16 %v346_v42, %v341_v41  ;;  %v348_v48 = vld [vmem:[%s261_s23] sm:$0xff]  ;;  %v312_v49 = vld [vmem:[#allocation6 + $0x20] sm:$0xff]  ;;  %v317_v50 = vld [vmem:[#allocation6 + $0x48] sm:$0xff]  ;;  %v993_v51 = vpack.c.bf16 %v345_v46, %v340_v45  ;;  %p1260_p9 = por %p1259_p1, %p1258_p13 }
  0xa4   : > { %974 = vmatpush1.bf16.msra.mxu0 %v973_v34  ;;  %v349_v52 = vcvt.s32.f32 %v348_v48  ;;  %v996_v53 = vpack.c.bf16 %v317_v50, %v312_v49  ;;  %v322_v55 = vld [vmem:[#allocation6 + $0x70] sm:$0xff]  ;;  %v327_v56 = vld [vmem:[#allocation6 + $0x98] sm:$0xff]  ;;  %v332_v58 = vld [vmem:[#allocation6 + $0xc0] sm:$0xff] }
  0xa5   : > { %976 = vmatprep.subr.bf16.mxu0 %v975_v39  ;;  %v999_v57 = vpack.c.bf16 %v327_v56, %v322_v55  ;;  %v337_v59 = vld [vmem:[#allocation6 + $0xe8] sm:$0xff]  ;;  %v342_v61 = vld [vmem:[#allocation6 + $0x110] sm:$0xff]  ;;  %v347_v62 = vld [vmem:[#allocation6 + $0x138] sm:$0xff]  ;;  %p1261_p11 = pnand %p1260_p9, %p1254_p3 }
  0xa6   : > { %990 = vmatpush1.bf16.msra.mxu1 %v989_v43  ;;  %v1002_v60 = vpack.c.bf16 %v337_v59, %v332_v58  ;;  %v1005_v63 = vpack.c.bf16 %v347_v62, %v342_v61  ;;  %v1620_v2 = vld [vmem:[%s1600_s8 + $0x8] sm:$0xff]  ;;  %v1623_v4 = vld [vmem:[%s1600_s8 + $0x10] sm:$0xff]  ;;  %v1627_v6 = vld [vmem:[%s1600_s8 + $0x18] sm:$0xff] }
  0xa7   : > { %992 = vmatprep.subr.bf16.mxu1 %v991_v44  ;;  %v567_v5 = vand.u32 2147483647, %v1620_v2  ;;  %v568_v7 = vand.u32 2147483647, %v1623_v4  ;;  %v569_v10 = vand.u32 2147483647, %v1627_v6 }
  0xa8   : > { %978 = vmatpush1.bf16.msra.mxu0 %v977_v47  ;;  %v1632_v16 = vld [vmem:[%s1600_s8 + $0x20] sm:$0xff]  ;;  %vm607_vm3 = vcmp.ge.f32.partialorder %v1620_v2, 0.0  ;;  %v642_v45 = vmax.f32 %v1620_v2, 0.0  ;;  %v643_v50 = vmax.f32 %v1623_v4, 0.0  ;;  %vm608_vm4 = vcmp.ge.f32.partialorder %v1623_v4, 0.0 }
  0xa9   : > { %995 = vmatprep.subr.bf16.mxu0 %v1350_v54  ;;  %v572_v9 = vsub.f32 0.0, %v567_v5  ;;  %v573_v11 = vsub.f32 0.0, %v568_v7  ;;  %v574_v13 = vsub.f32 0.0, %v569_v10  ;;  %v570_v17 = vand.u32 2147483647, %v1632_v16 }
  0xaa   : > { %994 = vmatpush1.bf16.msra.mxu1 %v993_v51  ;;  %v1644_v51 = vshrl.u32 %v677_v38, 7  ;;  %v632_v58 = vmin.f32 %v1620_v2, 0.0  ;;  %v647_v59 = vsub.f32 0.0, %v642_v45  ;;  %vm609_vm5 = vcmp.ge.f32.partialorder %v1627_v6, 0.0 }
  0xab   : > { %928 = vmatmul.mubr.msk.f32.vlgmr.msra.gmra.mrb[0].mxu0 %vm350_vm0, %v349_v52  ;;  %v578_v12 = vmul.f32 1.442695, %v572_v9  ;;  %v580_v14 = vmul.f32 1.442695, %v573_v11  ;;  %v582_v15 = vmul.f32 1.442695, %v574_v13 }
  0xac   : > { %997 = vmatpush3.bf16.msra.mxu0 %v996_v53  ;;  %960 = vmatprep.mubr.msk.f32.mxu0 %vm1351_vm1, %v1349_v0  ;;  %v1616_v0 = vld [vmem:[%s1600_s8] sm:$0xff]  ;;  %v575_v20 = vsub.f32 0.0, %v570_v17  ;;  %vm610_vm6 = vcmp.ge.f32.partialorder %v1632_v16, 0.0 }
  0xad   : > { %929 = vmatmul.mubr.msk.f32.vlgmr.msra.gmra.mrb[0].mxu1 %vm350_vm0, %v349_v52  ;;  %998 = vmatprep.subr.bf16.mxu0 %v1350_v54  ;;  %v566_v1 = vand.u32 2147483647, %v1616_v0  ;;  %v641_v29 = vmax.f32 %v1616_v0, 0.0  ;;  %vm606_vm2 = vcmp.ge.f32.partialorder %v1616_v0, 0.0  ;;  %v631_v44 = vmin.f32 %v1616_v0, 0.0 }
  0xae   : > { %v584_v23 = vmul.f32 1.442695, %v575_v20  ;;  %v648_v0 = vsub.f32 0.0, %v643_v50 }
  0xaf   : > { %v571_v3 = vsub.f32 0.0, %v566_v1  ;;  %v646_v35 = vsub.f32 0.0, %v641_v29 }
  0xb0   : > { %1000 = vmatpush3.bf16.msra.mxu0 %v999_v57 }
  0xb1   : > { %1001 = vmatprep.subr.bf16.mxu0 %v1350_v54  ;;  %v576_v8 = vmul.f32 1.442695, %v571_v3  ;;  %v634_v3 = vmin.f32 %v1627_v6, 0.0 }
  0xb3   : > { %1105 = vpow2.f32 %v576_v8 }
  0xb4   : > { %1003 = vmatpush3.bf16.msra.mxu0 %v1002_v60  ;;  %1107 = vpow2.f32 %v578_v12 }
  0xb5   : > { %1004 = vmatprep.subr.bf16.mxu0 %v1350_v54  ;;  %1109 = vpow2.f32 %v580_v14 }
  0xb6   : > { %1111 = vpow2.f32 %v582_v15 }
  0xb8   : > { %1006 = vmatpush3.bf16.msra.mxu0 %v1005_v63  ;;  %v633_v63 = vmin.f32 %v1623_v4, 0.0 }
  0xbb   : > { %961 = vmatmul.mubr.msk.f32.vlgmr.msra.gmra.mrb[2].mxu0 %vm350_vm0, %v349_v52  ;;  %v644_v52 = vmax.f32 %v1627_v6, 0.0 }
  0xbd   : > { %v1106_v18 = vpop.eup %1105  ;;  %v649_v5 = vsub.f32 0.0, %v644_v52 }
  0xbe   : > { %v586_v19 = vadd.f32 1.0, %v1106_v18  ;;  %v1108_v21 = vpop.eup %1107 }
  0xbf   : > { %v1110_v22 = vpop.eup %1109  ;;  %v587_v24 = vadd.f32 1.0, %v1108_v21 }
  0xc0   : > { %1113 = vrcp.f32 %v586_v19  ;;  %v1112_v25 = vpop.eup %1111  ;;  %v588_v26 = vadd.f32 1.0, %v1110_v22 }
  0xc1   : > { %1115 = vlog2.f32 %v586_v19  ;;  %v589_v27 = vadd.f32 1.0, %v1112_v25 }
  0xc2   : > { %1117 = vpow2.f32 %v584_v23  ;;  %v679_v23 = vsub.s32 0, %v1644_v51 }
  0xc3   : > { %1119 = vrcp.f32 %v587_v24 }
  0xc4   : > { %1121 = vrcp.f32 %v588_v26 }
  0xc5   : > { %1123 = vlog2.f32 %v587_v24 }
  0xc6   : > { %1125 = vrcp.f32 %v589_v27 }
  0xc7   : > { %1127 = vlog2.f32 %v588_v26 }
  0xc8   : > { %1129 = vlog2.f32 %v589_v27 }
  0xca   : > { %v1114_v28 = vpop.eup %1113 }
  0xcb   : > { %v1116_v30 = vpop.eup %1115  ;;  %v601_v31 = vmul.f32 %v1114_v28, %v1106_v18 }
  0xcc   : > { %v1636_v32 = vpop.eup %1117  ;;  %v622_v34 = vmul.f32 0.6931472, %v1116_v30 }
  0xcd   : > { %v1120_v33 = vpop.eup %1119  ;;  %v611_v37 = vsel %vm606_vm2, %v1114_v28, %v601_v31  ;;  %v590_v39 = vadd.f32 1.0, %v1636_v32  ;;  %v616_v43 = vsel %vm606_vm2, %v601_v31, %v1114_v28  ;;  %v683_v28 = vsub.s32 1, %v1644_v51 }
  0xce   : > { %v1122_v36 = vpop.eup %1121  ;;  %v602_v41 = vmul.f32 %v1120_v33, %v1108_v21  ;;  %v651_v47 = vsub.f32 %v646_v35, %v622_v34  ;;  %v666_v48 = vmul.f32 %v611_v37, %v611_v37  ;;  %v636_v7 = vsub.f32 %v631_v44, %v622_v34 }
  0xcf   : > { %v1124_v40 = vpop.eup %1123  ;;  %v603_v49 = vmul.f32 %v1122_v36, %v1110_v22  ;;  %1131 = vrcp.f32 %v590_v39  ;;  %v656_v8 = vmul.f32 %v616_v43, %v616_v43  ;;  %v687_v31 = vsub.s32 2, %v1644_v51 }
  0xd0   : > { %v1126_v42 = vpop.eup %1125  ;;  %v612_v54 = vsel %vm607_vm3, %v1120_v33, %v602_v41  ;;  %v617_v55 = vsel %vm607_vm3, %v602_v41, %v1120_v33  ;;  %v624_v56 = vmul.f32 0.6931472, %v1124_v40  ;;  %1133 = vlog2.f32 %v590_v39 }
  0xd1   : > { %v1128_v46 = vpop.eup %1127  ;;  %v604_v57 = vmul.f32 %v1126_v42, %v1112_v25  ;;  %v613_v61 = vsel %vm608_vm4, %v1122_v36, %v603_v49  ;;  %v618_v62 = vsel %vm608_vm4, %v603_v49, %v1122_v36  ;;  %v657_v12 = vmul.f32 %v617_v55, %v617_v55  ;;  %v1653_v25 = vld [vmem:[#allocation3] sm:$0x1f] }
  0xd2   : > { %v1130_v53 = vpop.eup %1129  ;;  %v626_v60 = vmul.f32 0.6931472, %v1128_v46  ;;  %v637_v11 = vsub.f32 %v632_v58, %v624_v56  ;;  %v652_v2 = vsub.f32 %v647_v59, %v624_v56  ;;  %v667_v13 = vmul.f32 %v612_v54, %v612_v54 }
  0xd3   : > { %v628_v1 = vmul.f32 0.6931472, %v1130_v53  ;;  %v614_v9 = vsel %vm609_vm5, %v1126_v42, %v604_v57  ;;  %v619_v10 = vsel %vm609_vm5, %v604_v57, %v1126_v42  ;;  %v658_v17 = vmul.f32 %v618_v62, %v618_v62 }
  0xd4   : > { %v638_v14 = vsub.f32 %v633_v63, %v626_v60  ;;  %v653_v15 = vsub.f32 %v648_v0, %v626_v60  ;;  %v668_v18 = vmul.f32 %v613_v61, %v613_v61  ;;  %v659_v20 = vmul.f32 %v619_v10, %v619_v10 }
  0xd5   : > { %v639_v19 = vsub.f32 %v634_v3, %v628_v1  ;;  %v654_v4 = vsub.f32 %v649_v5, %v628_v1  ;;  %v669_v21 = vmul.f32 %v614_v9, %v614_v9  ;;  %v661_v22 = vmul.f32 %v656_v8, %v636_v7 }
  0xd6   : > { %v671_v6 = vmul.f32 %v666_v48, %v651_v47  ;;  %v662_v26 = vmul.f32 %v657_v12, %v637_v11  ;;  %v672_v27 = vmul.f32 %v667_v13, %v652_v2  ;;  %v663_v29 = vmul.f32 %v658_v17, %v638_v14 }
  0xd7   : > { %v673_v30 = vmul.f32 %v668_v18, %v653_v15  ;;  %v691_v33 = vsub.s32 3, %v1644_v51  ;;  %v664_v34 = vmul.f32 %v659_v20, %v639_v19  ;;  %v674_v35 = vmul.f32 %v669_v21, %v654_v4 }
  0xd8   : > { %v645_v36 = vmax.f32 %v1632_v16, 0.0  ;;  %v680_v37 = vrot.slane %v1653_v25, %v679_v23  ;;  %v712_v38 = vmul.f32 0.25, %v661_v22  ;;  %v717_v39 = vmul.f32 0.75, %v671_v6 }
  0xd9   : > { %v1132_v24 = vpop.eup %1131  ;;  %v684_v42 = vrot.slane %v1653_v25, %v683_v28  ;;  %v713_v43 = vmul.f32 0.25, %v662_v26  ;;  %v718_v44 = vmul.f32 0.75, %v672_v27  ;;  %v688_v45 = vrot.slane %v1653_v25, %v687_v31 }
  0xda   : > { %v605_v40 = vmul.f32 %v1132_v24, %v1636_v32  ;;  %v1134_v41 = vpop.eup %1133  ;;  %v714_v46 = vmul.f32 0.25, %v663_v29  ;;  %v719_v47 = vmul.f32 0.75, %v673_v30  ;;  %v692_v48 = vrot.slane %v1653_v25, %v691_v33 }
  0xdb   : > { %v715_v50 = vmul.f32 0.25, %v664_v34  ;;  %v720_v52 = vmul.f32 0.75, %v674_v35  ;;  %v650_v53 = vsub.f32 0.0, %v645_v36  ;;  %v635_v54 = vmin.f32 %v1632_v16, 0.0 }
  0xdc   : > { %v615_v55 = vsel %vm610_vm6, %v1132_v24, %v605_v40  ;;  %v630_v56 = vmul.f32 0.6931472, %v1134_v41  ;;  %v620_v59 = vsel %vm610_vm6, %v605_v40, %v1132_v24  ;;  %v695_v14 = vsub.s32 4, %v1644_v51 }
  0xdd   : > { %v670_v10 = vmul.f32 %v615_v55, %v615_v55  ;;  %v660_v16 = vmul.f32 %v620_v59, %v620_v59 }
  0xde   : > { %v655_v9 = vsub.f32 %v650_v53, %v630_v56  ;;  %v640_v2 = vsub.f32 %v635_v54, %v630_v56  ;;  %v696_v4 = vrot.slane %v1653_v25, %v695_v14 }
  0xe0   : > { %v675_v17 = vmul.f32 %v670_v10, %v655_v9  ;;  %v665_v18 = vmul.f32 %v660_v16, %v640_v2 }
  0xe2   : > { %v721_v20 = vmul.f32 0.75, %v675_v17  ;;  %v716_v21 = vmul.f32 0.25, %v665_v18 }
 0x17e   : > { %v420_v49 = vpop.f32.mrb[0].mxu0 }
 0x17f   : > { %vm702_vm7 = vcmp.eq.f32.partialorder %v420_v49, %v680_v37  ;;  %vm707_vm8 = vcmp.ge.f32.partialorder %v420_v49, 0.0  ;;  %v422_v32 = vpop.f32.mrb[1].mxu0 }
 0x180   : > { %v722_v57 = vsel %vm707_vm8, %v717_v39, 0.0  ;;  %vm703_vm9 = vcmp.eq.f32.partialorder %v422_v32, %v684_v42  ;;  %vm708_vm10 = vcmp.ge.f32.partialorder %v422_v32, 0.0  ;;  %v491_v58 = vpop.f32.mrb[0].mxu1 }
 0x181   : > { %v727_v60 = vsel %vm702_vm7, %v712_v38, %v722_v57  ;;  %v723_v61 = vsel %vm708_vm10, %v718_v44, 0.0  ;;  %vm704_vm11 = vcmp.eq.f32.partialorder %v491_v58, %v688_v45  ;;  %vm709_vm12 = vcmp.ge.f32.partialorder %v491_v58, 0.0  ;;  %v493_v62 = vpop.f32.mrb[1].mxu1 }
 0x182   : > { %v732_v63 = vsub.f32 0.0, %v727_v60  ;;  %v728_v0 = vsel %vm703_vm9, %v713_v43, %v723_v61  ;;  %v724_v1 = vsel %vm709_vm12, %v719_v47, 0.0  ;;  %vm705_vm13 = vcmp.eq.f32.partialorder %v493_v62, %v692_v48 }
 0x183   : > { %v733_v3 = vsub.f32 0.0, %v728_v0  ;;  %v729_v5 = vsel %vm704_vm11, %v714_v46, %v724_v1  ;;  %vm710_vm14 = vcmp.ge.f32.partialorder %v493_v62, 0.0 }
 0x184   : > { %v734_v7 = vsub.f32 0.0, %v729_v5  ;;  %v725_v8 = vsel %vm710_vm14, %v720_v52, 0.0 }
 0x185   : > { %v730_v11 = vsel %vm705_vm13, %v715_v50, %v725_v8  ;;  %v765_v12 = vadd.f32 %v733_v3, %v732_v63 }
 0x186   : > { %v735_v13 = vsub.f32 0.0, %v730_v11 }
 0x187   : > { %v766_v15 = vadd.f32 %v765_v12, %v734_v7 }
 0x189   : > { %v767_v19 = vadd.f32 %v766_v15, %v735_v13 }
 0x18e   : > { %v562_v22 = vpop.f32.mrb[2].mxu0 }
 0x18f   : > { %vm706_vm15 = vcmp.eq.f32.partialorder %v562_v22, %v696_v4  ;;  %vm711_vm0 = vcmp.ge.f32.partialorder %v562_v22, 0.0  ;;  %v962_v6 = vpop.f32.mrb[3].mxu0 }
 0x190   : > { %v726_v23 = vsel %vm711_vm0, %v721_v20, 0.0 }
 0x191   : > { %v731_v24 = vsel %vm706_vm15, %v716_v21, %v726_v23 }
 0x192   : > { %v736_v26 = vsub.f32 0.0, %v731_v24 }
 0x194   : > { %v768_v27 = vadd.f32 %v767_v19, %v736_v26 }
 0x196   : > { %769 = vadd.xlane.f32.xlu0 %v768_v27 }
 0x223   : > { %v770_v51 = vpop.xlane.xlu0 %769 }
 0x224   : > { %v771_v28 = vrot.slane %v770_v51, 4 }
 0x226   : > { %v772_v29 = vadd.f32 %v771_v28, %v770_v51 }
 0x228   : > { %v773_v30 = vrot.slane %v772_v29, 2 }
 0x22a   : > { %v774_v25 = vadd.f32 %v773_v30, %v772_v29 }
 0x22c   : > { %v775_v31 = vrot.slane %v774_v25, 1 }
 0x22e   : > { %v776_v33 = vadd.f32 %v775_v31, %v774_v25 }
 0x230   : > { %1010 = vpush %v776_v33 }
 0x261   : > { %s1011_s28 = spop %1010 }
 0x262   : > { %v778_v34 = vstv %s1011_s28 }
 0x263   : > { %780 = vst [vmem:[%s290_s11] sm:$0xff] %v778_v34 }
 0x264   : > { %1264 = shalt.err (!%p1261_p11)
}
 0x265   : > { %s1265_s26 = scalar_lea.hbm %s1680_s2, 128  ;;  %s1269_s25 = scalar_lea.hbm %s1731_s4, 256 }
 0x266   : > { %p1266_p8 = scmp.ne.s32.totalorder %s1680_s2, %s1265_s26  ;;  %p1270_p10 = scmp.lt.u32.totalorder %s1680_s2, %s1731_s4 }
 0x267   : > { %p1271_p2 = scmp.lt.u32.totalorder %s1269_s25, %s1265_s26  ;;  %p1273_p4 = scmp.lt.u32.totalorder %s1265_s26, %s1680_s2 }
 0x268   : > { %p1267_p12 = pnand %p1266_p8, %p1768_p6 }
 0x269   : > { %p1272_p7 = por %p1271_p2, %p1270_p10 }
 0x26a   : > { %p1268_p5 = pneg %p1267_p12 }
 0x26b   : > { %p1274_p0 = por %p1273_p4, %p1272_p7 }
 0x26d   : > { %p1275_p3 = pnand %p1274_p0, %p1268_p5 }
 0x26f   : > { %1278 = shalt.err (!%p1275_p3)
}
 0x270   : > { %1024 = dma.vmem_to_hbm [thread:$0]  (%p1768_p6), %s1675_s12, 128, %s1680_s2, %s782_s0  }
 0x271 PF: > { %s807_s21 = sand.u32 1, %s1321_s15   ;;  %p1769_p13 = scmp.ne.s32.totalorder %s1745_s24, 0 }
 0x272   : > { %p1770_p1 = scmp.ge.s32.totalorder %s1341_s20, 2  ;;  %s808_s23 = scalar_lea.sflag [#allocation5], %s807_s21 }
 0x274   : > { %p1041_p9 = pnand %p1770_p1, %p1769_p13 }
 0x276   : > { %1316 = dma.done.wait (!%p1041_p9), %s808_s23, 128  }
 0x277   : > { %1318 = vsyncadd (!%p1041_p9), %s808_s23, 4294967168  ;;  %s19_s20 = sadd.s32 1, %s1341_s20   ;;  %s1771_s7 = sld [smem:[#allocation15_spill]] }
 0x278   : > { %p16_p11 = scmp.ge.s32.totalorder %s19_s20, 4   ;;  %s1772_s15 = smov %s1325_s16 }
 0x279   : > { %s1773_s16 = smov %s1329_s17  ;;  %s1774_s17 = smov %s1489_s9 }
 0x27a   : > { %s1775_s18 = smov %s1337_s19  ;;  %18 = sbr.rel (!%p16_p11) target bundleno = 9 (0x9), region = 107 }
 0x27d   : > { %s1776_s19 = smov %s1771_s7 }
 0x281   :  { %813 = vsyncpa [#allocation4], 1 }
 0x282   :  { %815 = vsyncpa [#allocation4 + $0x1], 1 }
 0x283   :  { %816 = vsyncpa [#allocation7], 1 }
 0x284   :  { %817 = vsyncpa [#allocation5], 1 }
 0x285   :  { %819 = vsyncpa [#allocation5 + $0x1], 1 }

</bundles_post_ra>
